<compile_context>
chip_gen: v6e
topology: v6e:2x2x1
jax: 0.10.0
libtpu: 0.0.40
codegen_flags: <defaults>
</compile_context>

<pallas_src>
import jax
import jax.numpy as jnp
from jax.experimental import pallas as pl
from jax.experimental.pallas import tpu as pltpu


def _round_up(x: int, m: int) -> int:
    return ((x + m - 1) // m) * m


def pointcnn_kernel(pos_ref, w1_ref, b1_ref, w2_ref, b2_ref, w3_ref, b3_ref,
                    out_ref, acc_ref):
    """One (cloud b, point-chunk k) step of the fused point classifier."""
    k = pl.program_id(1)

    # Init the per-cloud pooled-max accumulator on the first chunk.
    @pl.when(k == 0)
    def _():
        acc_ref[...] = jnp.full_like(acc_ref, -jnp.inf)

    pos = pos_ref[...]                                    # (TP, 3) f32
    w1 = w1_ref[...]                                      # (3, H1) f32

    # Layer 1 on the VPU: a K=3 contraction would use 3/256 of the MXU's
    # systolic dimension, so do it as three broadcast FMAs + bias instead.
    h1 = (pos[:, 0:1] * w1[0:1, :]
          + pos[:, 1:2] * w1[1:2, :]
          + pos[:, 2:3] * w1[2:3, :]
          + b1_ref[...])
    h1 = jnp.maximum(h1, 0.0)                             # (TP, H1) f32

    # Layer 2 on the MXU: bf16 operands, f32 accumulation.
    h2 = jnp.dot(h1.astype(jnp.bfloat16), w2_ref[...],
                 preferred_element_type=jnp.float32)
    h2 = jnp.maximum(h2 + b2_ref[...], 0.0)               # (TP, H2) f32

    # Fold this chunk into the per-cloud max pool (XLU sublane reduction).
    acc_ref[...] = jnp.maximum(acc_ref[...],
                               jnp.max(h2, axis=0, keepdims=True))

    # Classifier head + single lane-dense write-out on the last chunk.
    @pl.when(k == pl.num_programs(1) - 1)
    def _():
        logits = jnp.dot(acc_ref[...].astype(jnp.bfloat16), w3_ref[...],
                         preferred_element_type=jnp.float32)
        out_ref[...] = logits + b3_ref[...]               # (1, C_pad)


def init_params(key, in_dim=3, h1=128, h2=128, num_classes=10):
    """Lane-dense hidden widths (128) so the MXU N-dimension is fully used."""
    k1, k2, k3 = jax.random.split(key, 3)
    w1 = jax.random.normal(k1, (in_dim, h1), jnp.float32) * 0.1
    b1 = jnp.zeros((1, h1), jnp.float32)
    w2 = jax.random.normal(k2, (h1, h2), jnp.float32) * 0.1
    b2 = jnp.zeros((1, h2), jnp.float32)
    w3 = jax.random.normal(k3, (h2, num_classes), jnp.float32) * 0.1
    b3 = jnp.zeros((1, num_classes), jnp.float32)
    return (w1, b1, w2, b2, w3, b3)


def wrapper_forward(x, params, *, tp_max=2048):
    """Equivalent of Wrapper.forward: contiguous per-cloud batch ids, flatten
    points, run the point model, return (B, num_classes) logits."""
    B, P, _ = x.shape
    w1, b1, w2, b2, w3, b3 = params
    H1, H2 = w1.shape[1], w2.shape[1]
    C = w3.shape[1]
    C_pad = _round_up(C, 128)

    # Pad the class dim to a full 128-lane width (unmasked vst stores); extra
    # logits are sliced off after the call.
    w3_p = jnp.pad(w3, ((0, 0), (0, C_pad - C)))
    b3_p = jnp.pad(b3, ((0, 0), (0, C_pad - C)))

    # Point-chunk tile: multiple of 8 sublanes, capped so f32 activations plus
    # double-buffered input blocks stay far below v7x's 32 MiB scoped VMEM.
    TP = min(tp_max, _round_up(P, 8))
    P_pad = _round_up(P, TP)
    pos = x.astype(jnp.float32)
    if P_pad != P:
        # Edge-pad by repeating the last point of each cloud: duplicates are
        # invariant under the max pool, so semantics are unchanged.
        pos = jnp.pad(pos, ((0, 0), (0, P_pad - P), (0, 0)), mode="edge")

    # bf16 weights for the MXU matmuls (f32 accumulation in-kernel).
    w2_bf = w2.astype(jnp.bfloat16)
    w3_bf = w3_p.astype(jnp.bfloat16)

    n_chunks = P_pad // TP
    grid = (B, n_chunks)

    def wspec(shape):
        return pl.BlockSpec(shape, lambda b, k: (0, 0))

    cost = pl.CostEstimate(
        flops=2 * B * P_pad * (3 * H1 + H1 * H2) + 2 * B * H2 * C_pad,
        transcendentals=0,
        bytes_accessed=int(pos.size) * 4 + int(w2_bf.size) * 2
        + int(w3_bf.size) * 2
        + (int(w1.size) + int(b1.size) + int(b2.size) + int(b3_p.size)) * 4
        + B * C_pad * 4,
    )

    out = pl.pallas_call(
        pointcnn_kernel,
        out_shape=jax.ShapeDtypeStruct((B, 1, C_pad), jnp.float32),
        grid=grid,
        in_specs=[
            # Point data: (TP, 3) blocks streamed per (cloud, chunk).
            pl.BlockSpec((None, TP, 3), lambda b, k: (b, k, 0)),
            wspec(w1.shape), wspec(b1.shape),
            wspec(w2_bf.shape), wspec(b2.shape),
            wspec(w3_bf.shape), wspec(b3_p.shape),
        ],
        # Output block is resident across the chunk (reduction) axis; written
        # only on the last chunk.
        out_specs=pl.BlockSpec((None, 1, C_pad), lambda b, k: (b, 0, 0)),
        scratch_shapes=[pltpu.VMEM((1, H2), jnp.float32)],
        compiler_params=pltpu.CompilerParams(
            dimension_semantics=("parallel", "arbitrary"),
            vmem_limit_bytes=32 * 1024 * 1024,
        ),
        cost_estimate=cost,
    )(pos, w1, b1, w2_bf, b2, w3_bf, b3_p)

    return out[:, 0, :C]


def wrapper_forward_ref(x, params):
    """Pure-JAX reference (mirrors the kernel's bf16-operand matmuls)."""
    B, P, _ = x.shape
    pos = x.reshape(-1, 3).astype(jnp.float32)
    w1, b1, w2, b2, w3, b3 = params
    h1 = jnp.maximum(pos @ w1 + b1, 0.0)
    h2 = jnp.dot(h1.astype(jnp.bfloat16), w2.astype(jnp.bfloat16),
                 preferred_element_type=jnp.float32)
    h2 = jnp.maximum(h2 + b2, 0.0)
    pooled = jnp.max(h2.reshape(B, P, -1), axis=1)
    logits = jnp.dot(pooled.astype(jnp.bfloat16), w3.astype(jnp.bfloat16),
                     preferred_element_type=jnp.float32)
    return logits + b3


if __name__ == "__main__":
    key = jax.random.PRNGKey(0)
    kx, kp = jax.random.split(key)

    # Small point clouds: batch=2, 64 points per cloud, 3-D coords.
    x = jax.random.normal(kx, (2, 64, 3), jnp.float32)
    params = init_params(kp)

    out = wrapper_forward(x, params)
    out = jax.block_until_ready(out)

    ref = wrapper_forward_ref(x, params)
    assert out.shape == ref.shape == (2, 10)
    assert jnp.allclose(out, ref, atol=2e-2, rtol=2e-2), float(
        jnp.max(jnp.abs(out - ref)))

    print("KERNEL_OK")
</pallas_src>

<mosaic_0001>
module attributes {stable_mosaic.version = 11 : i64} {
  func.func @pointcnn_kernel(%arg0: i32, %arg1: i32, %arg2: memref<1x64x3xf32, #tpu.memory_space<vmem>>, %arg3: memref<3x128xf32, #tpu.memory_space<vmem>>, %arg4: memref<1x128xf32, #tpu.memory_space<vmem>>, %arg5: memref<128x128xbf16, #tpu.memory_space<vmem>>, %arg6: memref<1x128xf32, #tpu.memory_space<vmem>>, %arg7: memref<128x128xbf16, #tpu.memory_space<vmem>>, %arg8: memref<1x128xf32, #tpu.memory_space<vmem>>, %arg9: memref<1x1x128xf32, #tpu.memory_space<vmem>>, %arg10: memref<1x128xf32, #tpu.memory_space<vmem>>) attributes {dimension_semantics = [#tpu.dimension_semantics<parallel>, #tpu.dimension_semantics<arbitrary>], iteration_bounds = array<i64: 2, 1>, scalar_prefetch = 0 : i64, scratch_operands = 1 : i64, tpu.core_type = #tpu.core_type<tc>, window_params = [{transform_indices = @transform_0, window_bounds = array<i64: 1, 64, 3>}, {pipeline_mode = #tpu.pipeline_mode<synchronous>, transform_indices = @transform_1, window_bounds = array<i64: 3, 128>}, {pipeline_mode = #tpu.pipeline_mode<synchronous>, transform_indices = @transform_2, window_bounds = array<i64: 1, 128>}, {pipeline_mode = #tpu.pipeline_mode<synchronous>, transform_indices = @transform_3, window_bounds = array<i64: 128, 128>}, {pipeline_mode = #tpu.pipeline_mode<synchronous>, transform_indices = @transform_4, window_bounds = array<i64: 1, 128>}, {pipeline_mode = #tpu.pipeline_mode<synchronous>, transform_indices = @transform_5, window_bounds = array<i64: 128, 128>}, {pipeline_mode = #tpu.pipeline_mode<synchronous>, transform_indices = @transform_6, window_bounds = array<i64: 1, 128>}, {transform_indices = @transform_7, window_bounds = array<i64: 1, 1, 128>}]} {
    %c0_i32 = arith.constant 0 : i32
    %0 = arith.cmpi eq, %arg1, %c0_i32 : i32
    %1 = arith.extui %0 : i1 to i32
    %c0_i32_0 = arith.constant 0 : i32
    %2 = arith.cmpi ne, %1, %c0_i32_0 : i32
    scf.if %2 {
      %cst_20 = arith.constant 0xFF800000 : f32
      %44 = vector.broadcast %cst_20 : f32 to vector<1x128xf32>
      %c0_21 = arith.constant 0 : index
      %c0_22 = arith.constant 0 : index
      %45 = vector.load %arg10[%c0_21, %c0_22] : memref<1x128xf32, #tpu.memory_space<vmem>>, vector<1x128xf32>
      tpu.vector_store %arg10[%c0_21, %c0_22], %44 {strides = array<i32>} : memref<1x128xf32, #tpu.memory_space<vmem>>, vector<1x128xf32>,
    } else {
    }
    %c0 = arith.constant 0 : index
    %c0_1 = arith.constant 0 : index
    %c0_2 = arith.constant 0 : index
    %3 = vector.load %arg2[%c0, %c0_1, %c0_2] : memref<1x64x3xf32, #tpu.memory_space<vmem>>, vector<1x64x3xf32>
    %4 = vector.shape_cast %3 : vector<1x64x3xf32> to vector<64x3xf32>
    %c0_3 = arith.constant 0 : index
    %c0_4 = arith.constant 0 : index
    %5 = vector.load %arg3[%c0_3, %c0_4] : memref<3x128xf32, #tpu.memory_space<vmem>>, vector<3x128xf32>
    %6 = vector.extract_strided_slice %4 {offsets = [0, 0], sizes = [64, 1], strides = [1, 1]} : vector<64x3xf32> to vector<64x1xf32>
    %7 = vector.extract_strided_slice %5 {offsets = [0, 0], sizes = [1, 128], strides = [1, 1]} : vector<3x128xf32> to vector<1x128xf32>
    %8 = vector.broadcast %6 : vector<64x1xf32> to vector<64x128xf32>
    %9 = vector.broadcast %7 : vector<1x128xf32> to vector<64x128xf32>
    %10 = arith.mulf %8, %9 : vector<64x128xf32>
    %11 = vector.extract_strided_slice %4 {offsets = [0, 1], sizes = [64, 1], strides = [1, 1]} : vector<64x3xf32> to vector<64x1xf32>
    %12 = vector.extract_strided_slice %5 {offsets = [1, 0], sizes = [1, 128], strides = [1, 1]} : vector<3x128xf32> to vector<1x128xf32>
    %13 = vector.broadcast %11 : vector<64x1xf32> to vector<64x128xf32>
    %14 = vector.broadcast %12 : vector<1x128xf32> to vector<64x128xf32>
    %15 = arith.mulf %13, %14 : vector<64x128xf32>
    %16 = arith.addf %10, %15 : vector<64x128xf32>
    %17 = vector.extract_strided_slice %4 {offsets = [0, 2], sizes = [64, 1], strides = [1, 1]} : vector<64x3xf32> to vector<64x1xf32>
    %18 = vector.extract_strided_slice %5 {offsets = [2, 0], sizes = [1, 128], strides = [1, 1]} : vector<3x128xf32> to vector<1x128xf32>
    %19 = vector.broadcast %17 : vector<64x1xf32> to vector<64x128xf32>
    %20 = vector.broadcast %18 : vector<1x128xf32> to vector<64x128xf32>
    %21 = arith.mulf %19, %20 : vector<64x128xf32>
    %22 = arith.addf %16, %21 : vector<64x128xf32>
    %c0_5 = arith.constant 0 : index
    %c0_6 = arith.constant 0 : index
    %23 = vector.load %arg4[%c0_5, %c0_6] : memref<1x128xf32, #tpu.memory_space<vmem>>, vector<1x128xf32>
    %24 = vector.broadcast %23 : vector<1x128xf32> to vector<64x128xf32>
    %25 = arith.addf %22, %24 : vector<64x128xf32>
    %cst = arith.constant 0.000000e+00 : f32
    %26 = vector.broadcast %cst : f32 to vector<64x128xf32>
    %27 = arith.maximumf %25, %26 : vector<64x128xf32>
    %28 = arith.truncf %27 : vector<64x128xf32> to vector<64x128xbf16>
    %c0_7 = arith.constant 0 : index
    %c0_8 = arith.constant 0 : index
    %29 = vector.load %arg5[%c0_7, %c0_8] : memref<128x128xbf16, #tpu.memory_space<vmem>>, vector<128x128xbf16>
    %cst_9 = arith.constant dense<0.000000e+00> : vector<64x128xf32>
    %30 = tpu.matmul %28, %29, %cst_9 {dimension_numbers = #tpu.dot_dimension_numbers<[1], [0], [0], [1], [0, 0, 1, 1], [], []>} : vector<64x128xbf16>, vector<128x128xbf16>, vector<64x128xf32> -> vector<64x128xf32>
    %c0_10 = arith.constant 0 : index
    %c0_11 = arith.constant 0 : index
    %31 = vector.load %arg6[%c0_10, %c0_11] : memref<1x128xf32, #tpu.memory_space<vmem>>, vector<1x128xf32>
    %32 = vector.broadcast %31 : vector<1x128xf32> to vector<64x128xf32>
    %33 = arith.addf %30, %32 : vector<64x128xf32>
    %cst_12 = arith.constant 0.000000e+00 : f32
    %34 = vector.broadcast %cst_12 : f32 to vector<64x128xf32>
    %35 = arith.maximumf %33, %34 : vector<64x128xf32>
    %c0_13 = arith.constant 0 : index
    %c0_14 = arith.constant 0 : index
    %36 = vector.load %arg10[%c0_13, %c0_14] : memref<1x128xf32, #tpu.memory_space<vmem>>, vector<1x128xf32>
    %cst_15 = arith.constant dense<0xFF800000> : vector<128xf32>
    %37 = vector.multi_reduction <maximumf>, %35, %cst_15 [0] : vector<64x128xf32> to vector<128xf32>
    %38 = vector.shape_cast %37 : vector<128xf32> to vector<1x128xf32>
    %39 = arith.maximumf %36, %38 : vector<1x128xf32>
    %c0_16 = arith.constant 0 : index
    %c0_17 = arith.constant 0 : index
    %40 = vector.load %arg10[%c0_16, %c0_17] : memref<1x128xf32, #tpu.memory_space<vmem>>, vector<1x128xf32>
    tpu.vector_store %arg10[%c0_16, %c0_17], %39 {strides = array<i32>} : memref<1x128xf32, #tpu.memory_space<vmem>>, vector<1x128xf32>,
    %c0_i32_18 = arith.constant 0 : i32
    %41 = arith.cmpi eq, %arg1, %c0_i32_18 : i32
    %42 = arith.extui %41 : i1 to i32
    %c0_i32_19 = arith.constant 0 : i32
    %43 = arith.cmpi ne, %42, %c0_i32_19 : i32
    scf.if %43 {
      %c0_20 = arith.constant 0 : index
      %c0_21 = arith.constant 0 : index
      %44 = vector.load %arg10[%c0_20, %c0_21] : memref<1x128xf32, #tpu.memory_space<vmem>>, vector<1x128xf32>
      %45 = arith.truncf %44 : vector<1x128xf32> to vector<1x128xbf16>
      %c0_22 = arith.constant 0 : index
      %c0_23 = arith.constant 0 : index
      %46 = vector.load %arg7[%c0_22, %c0_23] : memref<128x128xbf16, #tpu.memory_space<vmem>>, vector<128x128xbf16>
      %cst_24 = arith.constant dense<0.000000e+00> : vector<1x128xf32>
      %47 = tpu.matmul %45, %46, %cst_24 {dimension_numbers = #tpu.dot_dimension_numbers<[1], [0], [0], [1], [0, 0, 1, 1], [], []>} : vector<1x128xbf16>, vector<128x128xbf16>, vector<1x128xf32> -> vector<1x128xf32>
      %c0_25 = arith.constant 0 : index
      %c0_26 = arith.constant 0 : index
      %48 = vector.load %arg8[%c0_25, %c0_26] : memref<1x128xf32, #tpu.memory_space<vmem>>, vector<1x128xf32>
      %49 = arith.addf %47, %48 : vector<1x128xf32>
      %c0_27 = arith.constant 0 : index
      %c0_28 = arith.constant 0 : index
      %c0_29 = arith.constant 0 : index
      %50 = vector.load %arg9[%c0_27, %c0_28, %c0_29] : memref<1x1x128xf32, #tpu.memory_space<vmem>>, vector<1x1x128xf32>
      %51 = vector.shape_cast %50 : vector<1x1x128xf32> to vector<1x128xf32>
      %52 = vector.shape_cast %49 : vector<1x128xf32> to vector<1x1x128xf32>
      tpu.vector_store %arg9[%c0_27, %c0_28, %c0_29], %52 {strides = array<i32>} : memref<1x1x128xf32, #tpu.memory_space<vmem>>, vector<1x1x128xf32>,
    } else {
    }
    return
  }
  func.func @transform_0(%arg0: i32, %arg1: i32) -> (i32, i32, i32) {
    %c0_i32 = arith.constant 0 : i32
    %c0_i32_0 = arith.constant 0 : i32
    return %arg0, %arg1, %c0_i32 : i32, i32, i32
  }
  func.func @transform_1(%arg0: i32, %arg1: i32) -> (i32, i32) {
    %c0_i32 = arith.constant 0 : i32
    %c0_i32_0 = arith.constant 0 : i32
    %c0_i32_1 = arith.constant 0 : i32
    return %c0_i32, %c0_i32_0 : i32, i32
  }
  func.func @transform_2(%arg0: i32, %arg1: i32) -> (i32, i32) {
    %c0_i32 = arith.constant 0 : i32
    %c0_i32_0 = arith.constant 0 : i32
    %c0_i32_1 = arith.constant 0 : i32
    return %c0_i32, %c0_i32_0 : i32, i32
  }
  func.func @transform_3(%arg0: i32, %arg1: i32) -> (i32, i32) {
    %c0_i32 = arith.constant 0 : i32
    %c0_i32_0 = arith.constant 0 : i32
    %c0_i32_1 = arith.constant 0 : i32
    return %c0_i32, %c0_i32_0 : i32, i32
  }
  func.func @transform_4(%arg0: i32, %arg1: i32) -> (i32, i32) {
    %c0_i32 = arith.constant 0 : i32
    %c0_i32_0 = arith.constant 0 : i32
    %c0_i32_1 = arith.constant 0 : i32
    return %c0_i32, %c0_i32_0 : i32, i32
  }
  func.func @transform_5(%arg0: i32, %arg1: i32) -> (i32, i32) {
    %c0_i32 = arith.constant 0 : i32
    %c0_i32_0 = arith.constant 0 : i32
    %c0_i32_1 = arith.constant 0 : i32
    return %c0_i32, %c0_i32_0 : i32, i32
  }
  func.func @transform_6(%arg0: i32, %arg1: i32) -> (i32, i32) {
    %c0_i32 = arith.constant 0 : i32
    %c0_i32_0 = arith.constant 0 : i32
    %c0_i32_1 = arith.constant 0 : i32
    return %c0_i32, %c0_i32_0 : i32, i32
  }
  func.func @transform_7(%arg0: i32, %arg1: i32) -> (i32, i32, i32) {
    %c0_i32 = arith.constant 0 : i32
    %c0_i32_0 = arith.constant 0 : i32
    %c0_i32_1 = arith.constant 0 : i32
    return %arg0, %c0_i32, %c0_i32_0 : i32, i32, i32
  }
}

</mosaic_0001>

<bundles_post_ra>
// kernel: tpu_custom_call.1
= control target key start
LH: loop header
LB: loop body
LE: loop exit
PB: predicated region body
PF: predicated region fallthrough
CT: control target
= control target key end

     0   :  { %12 = vsyncpa [#allocation4], 0  ;;  %s1394_s0 = inlined_call_operand.vmem [shape: f32[2,64,3], index: 0, kind: input, shape index: {}]   ;;  %s1395_s1 = inlined_call_operand.vmem [shape: f32[3,128], index: 1, kind: input, shape index: {}]   ;;  %s1396_s2 = inlined_call_operand.vmem [shape: f32[1,128], index: 2, kind: input, shape index: {}]   ;;  %s1397_s3 = inlined_call_operand.vmem [shape: bf16[128,128], index: 3, kind: input, shape index: {}]   ;;  %s1398_s4 = inlined_call_operand.vmem [shape: f32[1,128], index: 4, kind: input, shape index: {}]   ;;  %s1399_s5 = inlined_call_operand.vmem [shape: bf16[128,128], index: 5, kind: input, shape index: {}]   ;;  %s1400_s6 = inlined_call_operand.vmem [shape: f32[1,128], index: 6, kind: input, shape index: {}]   ;;  %s1401_s7 = inlined_call_operand.hbm [shape: f32[2,1,128], index: 7, kind: output, shape index: {}]  }
   0x1   :  { %14 = vsyncpa [#allocation4 + $0x1], 0  ;;  %s1164_s24 = smov 0   ;;  %s1166_s25 = smov 0  }
   0x2   :  { %s1168_s26 = smov 0   ;;  %s1170_s27 = smov 0  }
   0x3   :  { %s1172_s28 = smov 0   ;;  %s1174_s29 = smov 0  }
   0x4 LB: > { %s855_s30 = sadd.s32 4294967295, %s1115_s29   ;;  %s856_s8 = sadd.s32 4294967294, %s1115_s29   ;;  %s1115_s29 = sphi %s1174_s29, %s20_s29   ;;  %s1111_s28 = sphi %s1172_s28, %s1408_s28   ;;  %s1107_s27 = sphi %s1170_s27, %s1407_s27   ;;  %s1103_s26 = sphi %s1168_s26, %s1406_s26   ;;  %s1099_s25 = sphi %s1166_s25, %s1405_s25   ;;  %s1095_s24 = sphi %s1164_s24, %s1404_s24  }
   0x5   : > { %s32_s9 = sadd.s32 1, %s1111_s28  ;;  %s193_s10 = sadd.s32 1, %s1103_s26 }
   0x6   : > { %p34_p0 = scmp.ge.s32.totalorder %s32_s9, 2  ;;  %p203_p1 = scmp.ne.s32.totalorder %s1103_s26, %s1099_s25 }
   0x7   : > { %p204_p2 = scmp.eq.s32.totalorder %s855_s30, 1  ;;  %p209_p3 = scmp.ne.s32.totalorder %s1099_s25, %s1095_s24 }
   0x8   : > { %s1410_s9 = smov (%p34_p0, %s32_s9), 0  ;;  %p210_p5 = scmp.eq.s32.totalorder %s856_s8, 1 }
   0x9   : > { %p1204_p4 = por %p204_p2, %p203_p1  ;;  %s190_s12 = ssub.s32 %s1111_s28, %s1410_s9 }
   0xa   : > { %p859_p6 = scmp.ge.s32.totalorder %s1115_s29, 1  ;;  %p191_p7 = scmp.eq.s32.totalorder %s190_s12, 0 }
   0xb   : > { %p1211_p8 = por %p210_p5, %p209_p3  ;;  %p259_p9 = scmp.lt.s32.totalorder %s1115_s29, 3 }
   0xc   : > { %s1217_s14 = scalar_select %p191_p7, %s1103_s26, %s193_s10  }
   0xd   : > { %p260_p10 = pnand %p859_p6, %p259_p9 }
   0xe   : > { %p295_p11 = scmp.lt.s32.totalorder (!%p260_p10), %s1107_s27, 1  ;;  %s292_s20 = sand.u32 (!%p260_p10), 1, %s1099_s25  }
   0xf   : > { %263 = sbr.rel (%p260_p10) target bundleno = 661 (0x295), region = 48  ;;  %s880_s23 = sshll.u32 (!%p260_p10), %s1107_s27, 4 }
  0x10   : > { %s1348_s12 = scalar_lea.hbm (!%p260_p10), %s1401_s7, %s880_s23 }
  0x14   : > { %v1117_v0 = vmov 2   ;;  %v1118_v1 = vmov 1   ;;  %s296_s15 = scalar_select %p295_p11, %s1107_s27, 1  ;;  %v1023_v4 = vld [vmem:[%s1397_s3 + $0x38] sm:$0xff]   ;;  %v1024_v5 = vld [vmem:[%s1397_s3 + $0x30] sm:$0xff]   ;;  %v1119_v6 = vmov 0   ;;  %v359_v19 = vlaneseq }
  0x15   : > { %1014 = vset.pattern.permute.xlu0 %v1117_v0  ;;  %1010 = vset.pattern.permute.xlu1 %v1118_v1  ;;  %v1025_v8 = vld [vmem:[%s1397_s3 + $0x28] sm:$0xff]   ;;  %v1026_v10 = vld [vmem:[%s1397_s3 + $0x20] sm:$0xff]   ;;  %v1027_v12 = vld [vmem:[%s1397_s3 + $0x18] sm:$0xff]   ;;  %vm1122_vm0 = vmmov 0   ;;  %s1123_s27 = smov [#allocation3]  }
  0x16   : > { %s883_s16 = sshll.u32 %s296_s15, 6  ;;  %905 = vmatprep.subr.bf16.mxu0 %v1023_v4  ;;  %v1028_v13 = vld [vmem:[%s1397_s3 + $0x10] sm:$0xff]   ;;  %v1029_v15 = vld [vmem:[%s1397_s3 + $0x8] sm:$0xff]   ;;  %v1030_v17 = vld [vmem:[%s1397_s3] sm:$0xff]   ;;  %v360_v22 = vshrl.u32 %v359_v19, 7  ;;  %s774_s15 = scalar_lea.sflag [#allocation4], %s292_s20 }
  0x17   : > { %s1226_s19 = scalar_lea.vmem %s1394_s0, %s883_s16  ;;  %906 = vmatpush3.bf16.msra.mxu0 %v1023_v4  ;;  %v318_v28 = vld [vmem:[%s1395_s1] sm:$0x7]  ;;  %s1043_s17 = sshll.u32 %s1123_s27, 4  ;;  %s1044_s17 = int_to_ptr.vmem [resolvable:$false] %s1043_s17 }
  0x18   : > { %v311_v2 = vld [vmem:[%s1226_s19 + $0x8] sm:$0xff]  ;;  %v310_v3 = vld [vmem:[%s1226_s19] sm:$0xff]  ;;  %v313_v7 = vld [vmem:[%s1226_s19 + $0x18] sm:$0xff]  ;;  %907 = vmatprep.subr.bf16.mxu0 %v1024_v5  ;;  %v361_v24 = vsub.s32 0, %v360_v22  ;;  %v405_v26 = vsub.s32 1, %v360_v22  ;;  %v457_v27 = vsub.s32 2, %v360_v22 }
  0x19   : > { %428 = vperm.xlu0 %1014, %v311_v2   ;;  %372 = vperm.xlu1 %1010, %v310_v3   ;;  %v312_v9 = vld [vmem:[%s1226_s19 + $0x10] sm:$0xff]  ;;  %v314_v11 = vld [vmem:[%s1226_s19 + $0x20] sm:$0xff]  ;;  %v315_v14 = vld [vmem:[%s1226_s19 + $0x28] sm:$0xff]  ;;  %s1045_s18 = scalar_lea.vmem %s1044_s17, 32 }
  0x1a   : > { %v316_v16 = vld [vmem:[%s1226_s19 + $0x30] sm:$0xff]  ;;  %v317_v18 = vld [vmem:[%s1226_s19 + $0x38] sm:$0xff]  ;;  %v1270_v29 = vrot.slane %v318_v28, %v361_v24  ;;  %v1272_v32 = vrot.slane %v318_v28, %v405_v26  ;;  %v1274_v33 = vrot.slane %v318_v28, %v457_v27  ;;  %v1284_v45 = vld [vmem:[%s1396_s2] ss:$0 sm:$0xff]  ;;  %s293_s19 = scalar_lea.vmem [#allocation3], %s292_s20 }
  0x1b   : > { %908 = vmatpush3.bf16.msra.mxu0 %v1024_v5  ;;  %s786_s30 = sshll.u32 %s293_s19, 4  ;;  %s1350_s30 = int_to_ptr.vmem [resolvable:$true] %s786_s30 }
  0x1c   : > { %909 = vmatprep.subr.bf16.mxu0 %v1025_v8  ;;  %s1039_s16 = scalar_lea.vmem %s1350_s30, 16  ;;  %p1046_p1 = scmp.lt.s32.totalorder %s1350_s30, %s1044_s17 }
  0x1d   : > { %1015 = vset.pattern.permute.xlu0 %v1119_v6  ;;  %376 = vperm.xlu1 %1010, %v311_v2   ;;  %p1040_p12 = scmp.ne.s32.totalorder %s1350_s30, %s1039_s16  ;;  %p1047_p2 = scmp.lt.s32.totalorder %s1045_s18, %s1039_s16 }
  0x1e   : > { %321 = vperm.xlu0 %1015, %v310_v3  }
  0x1f   : > { %910 = vmatpush3.bf16.msra.mxu0 %v1025_v8  ;;  %p1041_p13 = pnand %p1040_p12, %p1204_p4  ;;  %p1048_p3 = por %p1047_p2, %p1046_p1 }
  0x20   : > { %911 = vmatprep.subr.bf16.mxu0 %v1026_v10 }
  0x21   : > { %1011 = vset.pattern.permute.xlu1 %v1119_v6  ;;  %p1042_p0 = pneg %p1041_p13 }
  0x22   : > { %326 = vperm.xlu0 %1015, %v311_v2   ;;  %336 = vperm.xlu1 %1011, %v313_v7  }
  0x23   : > { %912 = vmatpush3.bf16.msra.mxu0 %v1026_v10  ;;  %p1049_p5 = pnand %p1048_p3, %p1042_p0 }
  0x24   : > { %913 = vmatprep.subr.bf16.mxu0 %v1027_v12 }
  0x26   : > { %331 = vperm.xlu0 %1015, %v312_v9   ;;  %1012 = vset.pattern.permute.xlu1 %v1118_v1 }
  0x27   : > { %384 = vperm.xlu1 %1012, %v313_v7   ;;  %914 = vmatpush3.bf16.msra.mxu0 %v1027_v12 }
  0x28   : > { %915 = vmatprep.subr.bf16.mxu0 %v1028_v13 }
  0x2a   : > { %341 = vperm.xlu0 %1015, %v314_v11  }
  0x2b   : > { %1013 = vset.pattern.permute.xlu1 %v1117_v0  ;;  %916 = vmatpush3.bf16.msra.mxu0 %v1028_v13 }
  0x2c   : > { %424 = vperm.xlu1 %1013, %v310_v3   ;;  %917 = vmatprep.subr.bf16.mxu0 %v1029_v15 }
  0x2e   : > { %1016 = vset.pattern.permute.xlu0 %v1118_v1 }
  0x2f   : > { %380 = vperm.xlu0 %1016, %v312_v9   ;;  %918 = vmatpush3.bf16.msra.mxu0 %v1029_v15 }
  0x30   : > { %432 = vperm.xlu1 %1013, %v312_v9   ;;  %919 = vmatprep.subr.bf16.mxu0 %v1030_v17 }
  0x33   : > { %392 = vperm.xlu0 %1016, %v315_v14   ;;  %920 = vmatpush3.bf16.msra.mxu0 %v1030_v17 }
  0x34   : > { %436 = vperm.xlu1 %1013, %v313_v7  }
  0x37   : > { %396 = vperm.xlu0 %1016, %v316_v16  }
  0x38   : > { %1017 = vset.pattern.permute.xlu1 %v1119_v6 }
  0x39   : > { %346 = vperm.xlu1 %1017, %v315_v14  }
  0x3b   : > { %1021 = vset.pattern.permute.xlu0 %v1117_v0 }
  0x3c   : > { %440 = vperm.xlu0 %1021, %v314_v11  }
  0x3d   : > { %1018 = vset.pattern.permute.xlu1 %v1118_v1 }
  0x3e   : > { %388 = vperm.xlu1 %1018, %v314_v11  }
  0x40   : > { %452 = vperm.xlu0 %1021, %v317_v18  }
  0x42   : > { %1019 = vset.pattern.permute.xlu1 %v1119_v6 }
  0x43   : > { %351 = vperm.xlu1 %1019, %v316_v16  }
  0x47   : > { %356 = vperm.xlu1 %1019, %v317_v18  }
  0x4b   : > { %1020 = vset.pattern.permute.xlu1 %v1118_v1 }
  0x4c   : > { %400 = vperm.xlu1 %1020, %v317_v18  }
  0x50   : > { %1022 = vset.pattern.permute.xlu1 %v1117_v0 }
  0x51   : > { %444 = vperm.xlu1 %1022, %v315_v14  }
  0x55   : > { %448 = vperm.xlu1 %1022, %v316_v16  }
  0x94   : > { %v373_v20 = vpop.permute.xlu1 %372  ;;  %v429_v21 = vpop.permute.xlu0 %428 }
  0x95   : > { %v460_v37 = vmul.f32 %v1274_v33, %v429_v21  ;;  %v407_v42 = vmul.f32 %v1272_v32, %v373_v20 }
  0x98   : > { %v377_v23 = vpop.permute.xlu1 %376 }
  0x99   : > { %v322_v25 = vpop.permute.xlu0 %321  ;;  %v408_v35 = vmul.f32 %v1272_v32, %v377_v23 }
  0x9a   : > { %v363_v40 = vmul.f32 %v1270_v29, %v322_v25 }
  0x9c   : > { %v415_v46 = vadd.f32 %v407_v42, %v363_v40 }
  0x9d   : > { %v327_v30 = vpop.permute.xlu0 %326  ;;  %v337_v31 = vpop.permute.xlu1 %336 }
  0x9e   : > { %v364_v34 = vmul.f32 %v1270_v29, %v327_v30  ;;  %v366_v58 = vmul.f32 %v1270_v29, %v337_v31 }
  0xa0   : > { %v416_v38 = vadd.f32 %v408_v35, %v364_v34 }
  0xa1   : > { %v332_v36 = vpop.permute.xlu0 %331 }
  0xa2   : > { %v385_v39 = vpop.permute.xlu1 %384  ;;  %v468_v43 = vadd.f32 %v460_v37, %v416_v38  ;;  %v365_v48 = vmul.f32 %v1270_v29, %v332_v36 }
  0xa3   : > { %v410_v54 = vmul.f32 %v1272_v32, %v385_v39 }
  0xa4   : > { %v483_v51 = vadd.f32 %v1284_v45, %v468_v43 }
  0xa5   : > { %v342_v41 = vpop.permute.xlu0 %341  ;;  %v418_v63 = vadd.f32 %v410_v54, %v366_v58  ;;  %v1034_v54 = vld [vmem:[%s1399_s5 + $0x20] sm:$0xff]  }
  0xa6   : > { %v491_v60 = vmax.f32 %v483_v51, 0.0  ;;  %v367_v16 = vmul.f32 %v1270_v29, %v342_v41  ;;  %v1031_v51 = vld [vmem:[%s1399_s5 + $0x38] sm:$0xff]   ;;  %v1038_v58 = vld [vmem:[%s1399_s5] sm:$0xff]  }
  0xa7   : > { %v425_v44 = vpop.permute.xlu1 %424 }
  0xa8   : > { %v459_v47 = vmul.f32 %v1274_v33, %v425_v44 }
  0xaa   : > { %v467_v49 = vadd.f32 %v459_v47, %v415_v46  ;;  %v381_v50 = vpop.permute.xlu0 %380 }
  0xab   : > { %v409_v52 = vmul.f32 %v1272_v32, %v381_v50  ;;  %v433_v53 = vpop.permute.xlu1 %432 }
  0xac   : > { %v461_v55 = vmul.f32 %v1274_v33, %v433_v53  ;;  %v482_v56 = vadd.f32 %v1284_v45, %v467_v49  ;;  %v1033_v53 = vld [vmem:[%s1399_s5 + $0x28] sm:$0xff]  }
  0xad   : > { %v417_v57 = vadd.f32 %v409_v52, %v365_v48  ;;  %v1120_v52 = vmov 0.0  }
  0xae   : > { %v490_v59 = vmax.f32 %v482_v56, 0.0  ;;  %v393_v8 = vpop.permute.xlu0 %392  ;;  %929 = vmatprep.subr.bf16.mxu1 %v1120_v52  ;;  %v1036_v56 = vld [vmem:[%s1399_s5 + $0x10] sm:$0xff]   ;;  %945 = vmatprep.mubr.msk.bf16.mxu1 %vm1122_vm0, %v1120_v52 }
  0xaf   : > { %v469_v61 = vadd.f32 %v461_v55, %v417_v57  ;;  %v437_v62 = vpop.permute.xlu1 %436  ;;  %v412_v22 = vmul.f32 %v1272_v32, %v393_v8  ;;  %930 = vmatpush3.bf16.msra.mxu1 %v1031_v51  ;;  %v1035_v55 = vld [vmem:[%s1399_s5 + $0x18] sm:$0xff]   ;;  %v1037_v57 = vld [vmem:[%s1399_s5 + $0x8] sm:$0xff]  }
  0xb0   : > { %v462_v0 = vmul.f32 %v1274_v33, %v437_v62  ;;  %v498_v1 = vpack.c.bf16 %v491_v60, %v490_v59  ;;  %931 = vmatprep.subr.bf16.mxu1 %v1120_v52 }
  0xb1   : > { %v484_v2 = vadd.f32 %v1284_v45, %v469_v61 }
  0xb2   : > { %v470_v3 = vadd.f32 %v462_v0, %v418_v63  ;;  %921 = vmatprep.mubr.bf16.mxu0 %v498_v1  ;;  %v397_v11 = vpop.permute.xlu0 %396  ;;  %v863_v0 = vld [vmem:[%s1398_s4] ss:$0 sm:$0xff] }
  0xb3   : > { %v492_v6 = vmax.f32 %v484_v2, 0.0  ;;  %v413_v31 = vmul.f32 %v1272_v32, %v397_v11 }
  0xb4   : > { %v485_v4 = vadd.f32 %v1284_v45, %v470_v3  ;;  %v347_v5 = vpop.permute.xlu1 %346 }
  0xb5   : > { %v368_v23 = vmul.f32 %v1270_v29, %v347_v5 }
  0xb6   : > { %v493_v7 = vmax.f32 %v485_v4, 0.0 }
  0xb7   : > { %v441_v15 = vpop.permute.xlu0 %440  ;;  %v420_v30 = vadd.f32 %v412_v22, %v368_v23 }
  0xb8   : > { %v499_v9 = vpack.c.bf16 %v493_v7, %v492_v6  ;;  %v463_v18 = vmul.f32 %v1274_v33, %v441_v15 }
  0xb9   : > { %v389_v10 = vpop.permute.xlu1 %388 }
  0xba   : > { %922 = vmatmul.mubr.bf16.vlgmr.msra.gmra.mxu0 %v499_v9  ;;  %v411_v14 = vmul.f32 %v1272_v32, %v389_v10 }
  0xbb   : > { %v453_v21 = vpop.permute.xlu0 %452 }
  0xbc   : > { %v419_v17 = vadd.f32 %v411_v14, %v367_v16  ;;  %v466_v27 = vmul.f32 %v1274_v33, %v453_v21 }
  0xbe   : > { %v352_v12 = vpop.permute.xlu1 %351  ;;  %v471_v25 = vadd.f32 %v463_v18, %v419_v17 }
  0xbf   : > { %v369_v34 = vmul.f32 %v1270_v29, %v352_v12 }
  0xc0   : > { %v486_v36 = vadd.f32 %v1284_v45, %v471_v25 }
  0xc1   : > { %v421_v40 = vadd.f32 %v413_v31, %v369_v34 }
  0xc2   : > { %v357_v13 = vpop.permute.xlu1 %356  ;;  %v494_v43 = vmax.f32 %v486_v36, 0.0 }
  0xc3   : > { %v370_v24 = vmul.f32 %v1270_v29, %v357_v13 }
  0xc7   : > { %v401_v19 = vpop.permute.xlu1 %400 }
  0xc8   : > { %v414_v20 = vmul.f32 %v1272_v32, %v401_v19 }
  0xca   : > { %v422_v26 = vadd.f32 %v414_v20, %v370_v24 }
  0xcc   : > { %v445_v28 = vpop.permute.xlu1 %444  ;;  %v474_v37 = vadd.f32 %v466_v27, %v422_v26 }
  0xcd   : > { %v464_v35 = vmul.f32 %v1274_v33, %v445_v28 }
  0xce   : > { %v489_v44 = vadd.f32 %v1284_v45, %v474_v37 }
  0xcf   : > { %v472_v38 = vadd.f32 %v464_v35, %v420_v30 }
  0xd0   : > { %v449_v39 = vpop.permute.xlu1 %448  ;;  %v497_v48 = vmax.f32 %v489_v44, 0.0 }
  0xd1   : > { %v487_v41 = vadd.f32 %v1284_v45, %v472_v38  ;;  %v465_v42 = vmul.f32 %v1274_v33, %v449_v39  ;;  %v1121_v33 = vmov -inf  }
  0xd2   : > { %309 = vst [vmem:[#allocation2] sm:$0x1] %v1121_v33 }
  0xd3   : > { %v495_v46 = vmax.f32 %v487_v41, 0.0  ;;  %v473_v47 = vadd.f32 %v465_v42, %v421_v40  ;;  %v683_v40 = vld [vmem:[%s1400_s6] sm:$0x1] }
  0xd5   : > { %v488_v32 = vadd.f32 %v1284_v45, %v473_v47  ;;  %v500_v29 = vpack.c.bf16 %v495_v46, %v494_v43  ;;  %v1032_v45 = vld [vmem:[%s1399_s5 + $0x30] sm:$0xff]  }
  0xd6   : > { %932 = vmatpush3.bf16.msra.mxu1 %v1032_v45 }
  0xd7   : > { %v496_v49 = vmax.f32 %v488_v32, 0.0  ;;  %925 = vmatprep.mubr.bf16.mxu0 %v500_v29  ;;  %933 = vmatprep.subr.bf16.mxu1 %v1120_v52 }
  0xd9   : > { %v501_v50 = vpack.c.bf16 %v497_v48, %v496_v49  ;;  %v646_v35 = vld [vmem:[#allocation2] sm:$0x1] }
  0xda   : > { %934 = vmatpush3.bf16.msra.mxu1 %v1033_v53 }
  0xdb   : > { %926 = vmatmul.mubr.bf16.gmra.mxu0 %v501_v50  ;;  %935 = vmatprep.subr.bf16.mxu1 %v1120_v52 }
  0xde   : > { %936 = vmatpush3.bf16.msra.mxu1 %v1034_v54 }
  0xdf   : > { %937 = vmatprep.subr.bf16.mxu1 %v1120_v52 }
  0xe2   : > { %938 = vmatpush3.bf16.msra.mxu1 %v1035_v55 }
  0xe3   : > { %939 = vmatprep.subr.bf16.mxu1 %v1120_v52 }
  0xe6   : > { %940 = vmatpush3.bf16.msra.mxu1 %v1036_v56 }
  0xe7   : > { %941 = vmatprep.subr.bf16.mxu1 %v1120_v52 }
  0xea   : > { %942 = vmatpush3.bf16.msra.mxu1 %v1037_v57 }
  0xeb   : > { %943 = vmatprep.subr.bf16.mxu1 %v1120_v52 }
  0xee   : > { %944 = vmatpush3.bf16.msra.mxu1 %v1038_v58 }
 0x17a   : > { %v923_v59 = vpop.f32.mrf.mxu0 }
 0x17b   : > { %v616_v5 = vadd.f32 %v923_v59, %v863_v0 }
 0x17c   : > { %v607_v60 = vpop.f32.mrf.mxu0 }
 0x17d   : > { %v608_v7 = vadd.f32 %v863_v0, %v607_v60  ;;  %v640_v16 = vmax.f32 %v616_v5, 0.0 }
 0x17e   : > { %v924_v61 = vpop.f32.mrf.mxu0 }
 0x17f   : > { %v619_v1 = vadd.f32 %v924_v61, %v863_v0  ;;  %v638_v17 = vmax.f32 %v608_v7, 0.0 }
 0x180   : > { %v610_v62 = vpop.f32.mrf.mxu0 }
 0x181   : > { %v611_v8 = vadd.f32 %v863_v0, %v610_v62  ;;  %v641_v10 = vmax.f32 %v619_v1, 0.0 }
 0x183   : > { %v639_v18 = vmax.f32 %v611_v8, 0.0 }
 0x19b   : > { %v927_v63 = vpop.f32.mrf.mxu0 }
 0x19c   : > { %v632_v3 = vadd.f32 %v927_v63, %v863_v0 }
 0x19d   : > { %v623_v2 = vpop.f32.mrf.mxu0 }
 0x19e   : > { %v624_v4 = vadd.f32 %v863_v0, %v623_v2  ;;  %v644_v12 = vmax.f32 %v632_v3, 0.0 }
 0x19f   : > { %v928_v6 = vpop.f32.mrf.mxu0 }
 0x1a0   : > { %v635_v9 = vadd.f32 %v928_v6, %v863_v0  ;;  %v642_v13 = vmax.f32 %v624_v4, 0.0  ;;  %v649_v21 = vmax.f32 %v640_v16, %v644_v12 }
 0x1a1   : > { %v626_v11 = vpop.f32.mrf.mxu0 }
 0x1a2   : > { %v645_v14 = vmax.f32 %v635_v9, 0.0  ;;  %v627_v15 = vadd.f32 %v863_v0, %v626_v11  ;;  %v647_v22 = vmax.f32 %v638_v17, %v642_v13 }
 0x1a4   : > { %v650_v19 = vmax.f32 %v641_v10, %v645_v14  ;;  %v643_v20 = vmax.f32 %v627_v15, 0.0 }
 0x1a6   : > { %v648_v23 = vmax.f32 %v639_v18, %v643_v20  ;;  %v652_v24 = vmax.f32 %v649_v21, %v650_v19 }
 0x1a8   : > { %v651_v25 = vmax.f32 %v647_v22, %v648_v23 }
 0x1aa   : > { %v653_v26 = vmax.f32 %v651_v25, %v652_v24 }
 0x1ac   : > { %v654_v27 = vrot.slane %v653_v26, 4 }
 0x1ae   : > { %v655_v28 = vmax.f32 %v653_v26, %v654_v27 }
 0x1b0   : > { %v656_v30 = vrot.slane %v655_v28, 2 }
 0x1b2   : > { %v657_v31 = vmax.f32 %v655_v28, %v656_v30 }
 0x1b4   : > { %v658_v34 = vrot.slane %v657_v31, 1 }
 0x1b6   : > { %v659_v36 = vmax.f32 %v657_v31, %v658_v34 }
 0x1b8   : > { %v660_v37 = vmax.f32 %v646_v35, %v659_v36 }
 0x1ba   : > { %661 = vst [vmem:[#allocation2] sm:$0x1] %v660_v37 }
 0x1c1   : > { %v665_v38 = vld [vmem:[#allocation2] sm:$0x1] }
 0x1c2   : > { %v666_v39 = vpack.c.bf16 %v665_v38, %v665_v38 }
 0x1c4   : > { %946 = vmatmul.mubr.bf16.vlgmr.msra.gmra.mxu1 %v666_v39 }
 0x284   : > { %v766_v41 = vpop.f32.mrf.mxu1 }
 0x285   : > { %v767_v42 = vadd.f32 %v766_v41, %v683_v40 }
 0x286   : > { %v947_v43 = vpop.f32.mrf.mxu1 }
 0x287   : > { %772 = vst [vmem:[%s293_s19] sm:$0x1] %v767_v42 }
 0x288   : > { %v769_v44 = vpop.f32.mrf.mxu1 }
 0x289   : > { %1052 = shalt.err (!%p1049_p5)
}
 0x28a   : > { %s1053_s21 = scalar_lea.hbm %s1348_s12, 16  ;;  %s1057_s23 = scalar_lea.hbm %s1401_s7, 32 }
 0x28b   : > { %p1054_p6 = scmp.ne.s32.totalorder %s1348_s12, %s1053_s21  ;;  %p1058_p10 = scmp.lt.s32.totalorder %s1348_s12, %s1401_s7 }
 0x28c   : > { %p1059_p11 = scmp.lt.s32.totalorder %s1057_s23, %s1053_s21 }
 0x28d   : > { %p1055_p7 = pnand %p1054_p6, %p1204_p4 }
 0x28e   : > { %p1060_p12 = por %p1059_p11, %p1058_p10 }
 0x28f   : > { %p1056_p9 = pneg %p1055_p7 }
 0x291   : > { %p1061_p13 = pnand %p1060_p12, %p1056_p9 }
 0x293   : > { %1064 = shalt.err (!%p1061_p13)
}
 0x294   : > { %949 = dma.vmem_to_hbm [thread:$0]  (%p1204_p4), %s1350_s30, 16, %s1348_s12, %s774_s15   ;;  %v948_v46 = vpop.f32.mrf.mxu1 }
 0x295 PF: > { %p955_p0 = scmp.ge.s32.totalorder %s1115_s29, 2  ;;  %s798_s10 = sand.u32 1, %s1095_s24  }
 0x296   : > { %s799_s16 = scalar_lea.sflag [#allocation4], %s798_s10 }
 0x297   : > { %p952_p1 = pnand %p955_p0, %p1211_p8 }
 0x299   : > { %p953_p2 = pneg %p952_p1 }
 0x29b   : > { %1090 = dma.done.wait (%p953_p2), %s799_s16, 16  }
 0x29c   : > { %1092 = vsyncadd (%p953_p2), %s799_s16, 4294967280  ;;  %s20_s29 = sadd.s32 1, %s1115_s29   ;;  %s1404_s24 = smov %s1099_s25 }
 0x29d   : > { %p17_p3 = scmp.ge.s32.totalorder %s20_s29, 4   ;;  %s1405_s25 = smov %s1103_s26 }
 0x29e   : > { %s1406_s26 = smov %s1217_s14  ;;  %s1407_s27 = smov %s1111_s28 }
 0x29f   : > { %s1408_s28 = smov %s1410_s9  ;;  %19 = sbr.rel (!%p17_p3) target bundleno = 4 (0x4), region = 91 }
 0x2a4   :  { %803 = vsyncpa [#allocation4], 1 }
 0x2a5   :  { %805 = vsyncpa [#allocation4 + $0x1], 1 }

</bundles_post_ra>
